<compile_context>
chip_gen: v7x
topology: tpu7x:2x2x1
jax: 0.10.0
libtpu: 0.0.40
codegen_flags: <defaults>
</compile_context>

<pallas_src>
import functools

import jax
import jax.numpy as jnp
from jax.experimental import pallas as pl
from jax.experimental.pallas import tpu as pltpu


def _mlp_kernel(x_ref, w1_ref, b1_ref, w2_ref, b2_ref, w3_ref, b3_ref, o_ref):
    # All three matmuls + bias + ReLU fused, fully VMEM resident.
    x = x_ref[...]
    h1 = jnp.dot(x, w1_ref[...], preferred_element_type=jnp.float32) + b1_ref[...]
    h1 = jnp.maximum(h1, 0.0)
    h2 = jnp.dot(h1, w2_ref[...], preferred_element_type=jnp.float32) + b2_ref[...]
    h2 = jnp.maximum(h2, 0.0)
    q = jnp.dot(h2, w3_ref[...], preferred_element_type=jnp.float32) + b3_ref[...]
    o_ref[...] = q.astype(o_ref.dtype)


def _round_up(n, m):
    return (n + m - 1) // m * m


def prepare_params(params):
    """One-time lane padding of the hidden dim to 128.

    Call this at init and after each optimizer update (i.e. whenever the raw
    (in, out)-layout params change), NOT inside the per-step forward — the
    pads would otherwise be re-traced and re-executed on every call.
    """
    w1, b1 = params["w1"], params["b1"]
    w2, b2 = params["w2"], params["b2"]
    w3, b3 = params["w3"], params["b3"]
    H = w1.shape[1]
    Hp = _round_up(H, 128)
    if Hp != H:
        w1 = jnp.pad(w1, ((0, 0), (0, Hp - H)))
        b1 = jnp.pad(b1, ((0, 0), (0, Hp - H)))
        w2 = jnp.pad(w2, ((0, Hp - H), (0, Hp - H)))
        b2 = jnp.pad(b2, ((0, 0), (0, Hp - H)))
        w3 = jnp.pad(w3, ((0, Hp - H), (0, 0)))
    # Action dim intentionally left unpadded (narrow output writeback).
    return {"w1": w1, "b1": b1, "w2": w2, "b2": b2, "w3": w3, "b3": b3}


@functools.partial(
    jax.jit, static_argnames=("max_batch_tile", "single_call_max_batch")
)
def action_value_network(
    x, padded_params, *, max_batch_tile=2048, single_call_max_batch=8192
):
    """Forward pass of ActionValueNetwork via a fused Pallas kernel.

    x: (B, state_dim) float32
    padded_params: output of `prepare_params` — w1 (S,Hp), b1 (1,Hp),
                   w2 (Hp,Hp), b2 (1,Hp), w3 (Hp,A), b3 (1,A), Hp % 128 == 0.
    returns: (B, num_actions) float32
    """
    w1, b1 = padded_params["w1"], padded_params["b1"]
    w2, b2 = padded_params["w2"], padded_params["b2"]
    w3, b3 = padded_params["w3"], padded_params["b3"]

    B, S = x.shape
    Hp = w1.shape[1]
    A = w3.shape[1]

    # Batch is rounded only to the 8-row sublane granule.
    Bp = _round_up(B, 8)

    if Bp <= single_call_max_batch:
        n_tiles = 1
        batch_tile = Bp
    else:
        # Even number of large tiles so v7x's two TensorCores split the grid
        # evenly; on single-TC v5e/v6e the per-step overhead at these batch
        # sizes is negligible relative to the work per tile.
        n_tiles = 2 * pl.cdiv(Bp, 2 * max_batch_tile)
        batch_tile = _round_up(pl.cdiv(Bp, n_tiles), 8)
        Bp = batch_tile * n_tiles

    if Bp != B:
        x = jnp.pad(x, ((0, Bp - B), (0, 0)))

    out_shape = jax.ShapeDtypeStruct((Bp, A), jnp.float32)

    if n_tiles == 1:
        # Single ungridded call: everything lives in VMEM, zero grid-step
        # overhead, no redundant weight re-fetch.
        out = pl.pallas_call(
            _mlp_kernel,
            out_shape=out_shape,
        )(x, w1, b1, w2, b2, w3, b3)
    else:
        out = pl.pallas_call(
            _mlp_kernel,
            out_shape=out_shape,
            grid=(n_tiles,),
            in_specs=[
                # x / out tiled over batch; weights & biases replicated
                # (block_shape == full array shape).
                pl.BlockSpec((batch_tile, S), lambda i: (i, 0)),
                pl.BlockSpec((S, Hp), lambda i: (0, 0)),
                pl.BlockSpec((1, Hp), lambda i: (0, 0)),
                pl.BlockSpec((Hp, Hp), lambda i: (0, 0)),
                pl.BlockSpec((1, Hp), lambda i: (0, 0)),
                pl.BlockSpec((Hp, A), lambda i: (0, 0)),
                pl.BlockSpec((1, A), lambda i: (0, 0)),
            ],
            out_specs=pl.BlockSpec((batch_tile, A), lambda i: (i, 0)),
            compiler_params=pltpu.CompilerParams(
                dimension_semantics=("parallel",)
            ),
        )(x, w1, b1, w2, b2, w3, b3)

    # Only slice when the batch actually needed padding (action dim is never
    # padded, so no lane slice is ever emitted).
    if Bp != B:
        out = out[:B]
    return out


def init_params(key, state_dim, num_hidden_units, num_actions):
    """Deterministic init mirroring nn.Linear's uniform(-1/sqrt(fan_in), ...).

    Weights are stored pre-transposed as (in, out) for the kernel.
    """
    ks = jax.random.split(key, 6)

    def lin(kw, kb, fan_in, fan_out):
        bound = 1.0 / jnp.sqrt(float(fan_in))
        w = jax.random.uniform(kw, (fan_in, fan_out), jnp.float32, -bound, bound)
        b = jax.random.uniform(kb, (1, fan_out), jnp.float32, -bound, bound)
        return w, b

    w1, b1 = lin(ks[0], ks[1], state_dim, num_hidden_units)
    w2, b2 = lin(ks[2], ks[3], num_hidden_units, num_hidden_units)
    w3, b3 = lin(ks[4], ks[5], num_hidden_units, num_actions)
    return {"w1": w1, "b1": b1, "w2": w2, "b2": b2, "w3": w3, "b3": b3}


def reference_forward(x, params):
    h1 = jnp.maximum(x @ params["w1"] + params["b1"], 0.0)
    h2 = jnp.maximum(h1 @ params["w2"] + params["b2"], 0.0)
    return h2 @ params["w3"] + params["b3"]


if __name__ == "__main__":
    # Small shapes consistent with the DQN config:
    # state_dim=8 (LunarLander obs), hidden=32, num_actions=4, batch=2.
    STATE_DIM, HIDDEN, ACTIONS, BATCH = 8, 32, 4, 2

    key = jax.random.PRNGKey(0)
    k_params, k_x, k_x2 = jax.random.split(key, 3)

    params = init_params(k_params, STATE_DIM, HIDDEN, ACTIONS)
    padded_params = jax.tree_util.tree_map(
        jax.block_until_ready, prepare_params(params)
    )

    # --- Small batch: single ungridded pallas_call path. ---
    x = jax.random.normal(k_x, (BATCH, STATE_DIM), jnp.float32)
    q = jax.block_until_ready(action_value_network(x, padded_params))
    q_ref = reference_forward(x, params)
    assert q.shape == (BATCH, ACTIONS), q.shape
    assert jnp.allclose(q, q_ref, atol=1e-5, rtol=1e-5), (q, q_ref)

    # --- Larger batch, forced onto the tiled parallel-grid path (even tiles). ---
    B2 = 600
    x2 = jax.random.normal(k_x2, (B2, STATE_DIM), jnp.float32)
    q2 = jax.block_until_ready(
        action_value_network(
            x2, padded_params, max_batch_tile=256, single_call_max_batch=128
        )
    )
    q2_ref = reference_forward(x2, params)
    assert q2.shape == (B2, ACTIONS), q2.shape
    assert jnp.allclose(q2, q2_ref, atol=1e-4, rtol=1e-4)

    print("KERNEL_OK")
</pallas_src>

<mosaic_0001>
module attributes {stable_mosaic.version = 11 : i64} {
  func.func @_mlp_kernel(%arg0: memref<8x8xf32, #tpu.memory_space<vmem>>, %arg1: memref<8x128xf32, #tpu.memory_space<vmem>>, %arg2: memref<1x128xf32, #tpu.memory_space<vmem>>, %arg3: memref<128x128xf32, #tpu.memory_space<vmem>>, %arg4: memref<1x128xf32, #tpu.memory_space<vmem>>, %arg5: memref<128x4xf32, #tpu.memory_space<vmem>>, %arg6: memref<1x4xf32, #tpu.memory_space<vmem>>, %arg7: memref<8x4xf32, #tpu.memory_space<vmem>>) attributes {dimension_semantics = [], scalar_prefetch = 0 : i64, scratch_operands = 0 : i64, tpu.core_type = #tpu.core_type<tc>} {
    %c0 = arith.constant 0 : index
    %c0_0 = arith.constant 0 : index
    %0 = vector.load %arg0[%c0, %c0_0] : memref<8x8xf32, #tpu.memory_space<vmem>>, vector<8x8xf32>
    %c0_1 = arith.constant 0 : index
    %c0_2 = arith.constant 0 : index
    %1 = vector.load %arg1[%c0_1, %c0_2] : memref<8x128xf32, #tpu.memory_space<vmem>>, vector<8x128xf32>
    %cst = arith.constant dense<0.000000e+00> : vector<8x128xf32>
    %2 = tpu.matmul %0, %1, %cst {dimension_numbers = #tpu.dot_dimension_numbers<[1], [0], [0], [1], [0, 0, 1, 1], [], []>} : vector<8x8xf32>, vector<8x128xf32>, vector<8x128xf32> -> vector<8x128xf32>
    %c0_3 = arith.constant 0 : index
    %c0_4 = arith.constant 0 : index
    %3 = vector.load %arg2[%c0_3, %c0_4] : memref<1x128xf32, #tpu.memory_space<vmem>>, vector<1x128xf32>
    %4 = vector.broadcast %3 : vector<1x128xf32> to vector<8x128xf32>
    %5 = arith.addf %2, %4 : vector<8x128xf32>
    %cst_5 = arith.constant 0.000000e+00 : f32
    %6 = vector.broadcast %cst_5 : f32 to vector<8x128xf32>
    %7 = arith.maximumf %5, %6 : vector<8x128xf32>
    %c0_6 = arith.constant 0 : index
    %c0_7 = arith.constant 0 : index
    %8 = vector.load %arg3[%c0_6, %c0_7] : memref<128x128xf32, #tpu.memory_space<vmem>>, vector<128x128xf32>
    %cst_8 = arith.constant dense<0.000000e+00> : vector<8x128xf32>
    %9 = tpu.matmul %7, %8, %cst_8 {dimension_numbers = #tpu.dot_dimension_numbers<[1], [0], [0], [1], [0, 0, 1, 1], [], []>} : vector<8x128xf32>, vector<128x128xf32>, vector<8x128xf32> -> vector<8x128xf32>
    %c0_9 = arith.constant 0 : index
    %c0_10 = arith.constant 0 : index
    %10 = vector.load %arg4[%c0_9, %c0_10] : memref<1x128xf32, #tpu.memory_space<vmem>>, vector<1x128xf32>
    %11 = vector.broadcast %10 : vector<1x128xf32> to vector<8x128xf32>
    %12 = arith.addf %9, %11 : vector<8x128xf32>
    %cst_11 = arith.constant 0.000000e+00 : f32
    %13 = vector.broadcast %cst_11 : f32 to vector<8x128xf32>
    %14 = arith.maximumf %12, %13 : vector<8x128xf32>
    %c0_12 = arith.constant 0 : index
    %c0_13 = arith.constant 0 : index
    %15 = vector.load %arg5[%c0_12, %c0_13] : memref<128x4xf32, #tpu.memory_space<vmem>>, vector<128x4xf32>
    %cst_14 = arith.constant dense<0.000000e+00> : vector<8x4xf32>
    %16 = tpu.matmul %14, %15, %cst_14 {dimension_numbers = #tpu.dot_dimension_numbers<[1], [0], [0], [1], [0, 0, 1, 1], [], []>} : vector<8x128xf32>, vector<128x4xf32>, vector<8x4xf32> -> vector<8x4xf32>
    %c0_15 = arith.constant 0 : index
    %c0_16 = arith.constant 0 : index
    %17 = vector.load %arg6[%c0_15, %c0_16] : memref<1x4xf32, #tpu.memory_space<vmem>>, vector<1x4xf32>
    %18 = vector.broadcast %17 : vector<1x4xf32> to vector<8x4xf32>
    %19 = arith.addf %16, %18 : vector<8x4xf32>
    %c0_17 = arith.constant 0 : index
    %c0_18 = arith.constant 0 : index
    %20 = vector.load %arg7[%c0_17, %c0_18] : memref<8x4xf32, #tpu.memory_space<vmem>>, vector<8x4xf32>
    tpu.vector_store %arg7[%c0_17, %c0_18], %19 {strides = array<i32>} : memref<8x4xf32, #tpu.memory_space<vmem>>, vector<8x4xf32>,
    return
  }
}

</mosaic_0001>

<bundles_post_ra>
// kernel: action_value_network.1
= control target key start
LH: loop header
LB: loop body
LE: loop exit
PB: predicated region body
PF: predicated region fallthrough
CT: control target
= control target key end

     0   :  { %vm35_vm0 = vcmask 64512   ;;  %v469_v0 = vmov 0.0   ;;  %vm470_vm1 = vmmov 0   ;;  %v471_v4 = vmov 0.0|0.0   ;;  %s642_s1 = inlined_call_operand.vmem [shape: f32[8,128], index: 1, kind: input, shape index: {}]   ;;  %s643_s0 = inlined_call_operand.vmem [shape: f32[8,8], index: 0, kind: input, shape index: {}]   ;;  %s644_s3 = inlined_call_operand.vmem [shape: f32[128,128], index: 3, kind: input, shape index: {}]   ;;  %s645_s5 = inlined_call_operand.vmem [shape: f32[128,4], index: 5, kind: input, shape index: {}]   ;;  %s646_s2 = inlined_call_operand.vmem [shape: f32[1,128], index: 2, kind: input, shape index: {}]   ;;  %s647_s4 = inlined_call_operand.vmem [shape: f32[1,128], index: 4, kind: input, shape index: {}]   ;;  %s648_s6 = inlined_call_operand.vmem [shape: f32[1,4], index: 6, kind: input, shape index: {}]   ;;  %s649_s7 = inlined_call_operand.vmem [shape: f32[8,4], index: 7, kind: output, shape index: {}]  }
   0x1   :  { %343 = vmatprep.subr.mxu0 %v469_v0  ;;  %v27_v1 = vld [vmem:[%s642_s1] sm:$0xff]  ;;  %345 = vmatprep.mubr.msk.f32.mxu0 %vm470_vm1, %v469_v0  ;;  %v111_v5 = vld [vmem:[%s644_s3 + $0x8] sm:$0xff]  ;;  %v112_v6 = vld [vmem:[%s644_s3 + $0x10] sm:$0xff]  ;;  %vm297_vm2 = vcmask 31744  }
   0x2   :  { %v26_v2 = vld [vmem:[%s643_s0] sm:$0xff]  ;;  %344 = vmatpush3.msra.mxu0 %v27_v1  ;;  %418 = vmatprep.subr.bf16.mxu1 %v471_v4  ;;  %v113_v7 = vld [vmem:[%s644_s3 + $0x18] sm:$0xff]  ;;  %v115_v11 = vld [vmem:[%s644_s3 + $0x28] sm:$0xff] }
   0x3   :  { %v110_v3 = vld [vmem:[%s644_s3] sm:$0xff]  ;;  %346 = vmatmul.mubr.msk.f32.vlgmr.msra.gmra.mrb[0].mxu0 %vm35_vm0, %v26_v2  ;;  %380 = vmatprep.mubr.msk.f32.mxu1 %vm470_vm1, %v469_v0  ;;  %v422_v9 = vpack.c.bf16 %v113_v7, %v112_v6  ;;  %v116_v13 = vld [vmem:[%s644_s3 + $0x30] sm:$0xff]  ;;  %v117_v14 = vld [vmem:[%s644_s3 + $0x38] sm:$0xff] }
   0x4   :  { %v419_v8 = vpack.c.bf16 %v111_v5, %v110_v3  ;;  %442 = vmatprep.subr.bf16.mxu0 %v471_v4  ;;  %415 = vmatprep.mubr.msk.f32.mxu0 %vm470_vm1, %v469_v0  ;;  %v114_v10 = vld [vmem:[%s644_s3 + $0x20] sm:$0xff]  ;;  %v428_v15 = vpack.c.bf16 %v117_v14, %v116_v13  ;;  %v119_v17 = vld [vmem:[%s644_s3 + $0x48] sm:$0xff]  ;;  %v120_v19 = vld [vmem:[%s644_s3 + $0x50] sm:$0xff] }
   0x5   :  { %v425_v12 = vpack.c.bf16 %v115_v11, %v114_v10  ;;  %v118_v16 = vld [vmem:[%s644_s3 + $0x40] sm:$0xff]  ;;  %v121_v20 = vld [vmem:[%s644_s3 + $0x58] sm:$0xff]  ;;  %v123_v23 = vld [vmem:[%s644_s3 + $0x68] sm:$0xff] }
   0x6   :  { %420 = vmatpush3.bf16.msra.mxu1 %v419_v8  ;;  %v431_v18 = vpack.c.bf16 %v119_v17, %v118_v16  ;;  %v434_v21 = vpack.c.bf16 %v121_v20, %v120_v19  ;;  %v122_v22 = vld [vmem:[%s644_s3 + $0x60] sm:$0xff]  ;;  %v124_v25 = vld [vmem:[%s644_s3 + $0x70] sm:$0xff]  ;;  %v125_v26 = vld [vmem:[%s644_s3 + $0x78] sm:$0xff] }
   0x7   :  { %421 = vmatprep.subr.bf16.mxu1 %v471_v4  ;;  %v437_v24 = vpack.c.bf16 %v123_v23, %v122_v22  ;;  %v440_v27 = vpack.c.bf16 %v125_v26, %v124_v25  ;;  %v204_v28 = vld [vmem:[%s645_s5] sm:$0xff]  ;;  %v205_v29 = vld [vmem:[%s645_s5 + $0x8] sm:$0xff]  ;;  %v206_v30 = vld [vmem:[%s645_s5 + $0x10] sm:$0xff] }
   0x8   :  { %v443_v31 = vpack.c.bf16 %v205_v29, %v204_v28  ;;  %v207_v32 = vld [vmem:[%s645_s5 + $0x18] sm:$0xff]  ;;  %v208_v34 = vld [vmem:[%s645_s5 + $0x20] sm:$0xff]  ;;  %v209_v35 = vld [vmem:[%s645_s5 + $0x28] sm:$0xff] }
   0x9   :  { %v446_v33 = vpack.c.bf16 %v207_v32, %v206_v30  ;;  %v449_v36 = vpack.c.bf16 %v209_v35, %v208_v34  ;;  %v210_v37 = vld [vmem:[%s645_s5 + $0x30] sm:$0xff]  ;;  %v211_v38 = vld [vmem:[%s645_s5 + $0x38] sm:$0xff]  ;;  %v212_v40 = vld [vmem:[%s645_s5 + $0x40] sm:$0xff] }
   0xa   :  { %423 = vmatpush3.bf16.msra.mxu1 %v422_v9  ;;  %444 = vmatpush3.bf16.msra.mxu0 %v443_v31  ;;  %v452_v39 = vpack.c.bf16 %v211_v38, %v210_v37  ;;  %v213_v41 = vld [vmem:[%s645_s5 + $0x48] sm:$0xff]  ;;  %v214_v43 = vld [vmem:[%s645_s5 + $0x50] sm:$0xff]  ;;  %v215_v44 = vld [vmem:[%s645_s5 + $0x58] sm:$0xff] }
   0xb   :  { %424 = vmatprep.subr.bf16.mxu1 %v471_v4  ;;  %445 = vmatprep.subr.bf16.mxu0 %v471_v4  ;;  %v455_v42 = vpack.c.bf16 %v213_v41, %v212_v40  ;;  %v458_v45 = vpack.c.bf16 %v215_v44, %v214_v43  ;;  %v216_v46 = vld [vmem:[%s645_s5 + $0x60] sm:$0xff]  ;;  %v217_v47 = vld [vmem:[%s645_s5 + $0x68] sm:$0xff]  ;;  %v218_v54 = vld [vmem:[%s645_s5 + $0x70] sm:$0xff] }
   0xc   :  { %v461_v48 = vpack.c.bf16 %v217_v47, %v216_v46  ;;  %v303_v49 = vld [vmem:[%s646_s2] ss:$0 sm:$0xff]  ;;  %v219_v55 = vld [vmem:[%s645_s5 + $0x78] sm:$0xff] }
   0xd   :  { %v464_v56 = vpack.c.bf16 %v219_v55, %v218_v54  ;;  %v305_v57 = vld [vmem:[%s647_s4] ss:$0 sm:$0xff] }
   0xe   :  { %426 = vmatpush3.bf16.msra.mxu1 %v425_v12  ;;  %447 = vmatpush3.bf16.msra.mxu0 %v446_v33  ;;  %v306_v62 = vld [vmem:[%s648_s6] ss:$0 sm:$0xff] }
   0xf   :  { %427 = vmatprep.subr.bf16.mxu1 %v471_v4  ;;  %448 = vmatprep.subr.bf16.mxu0 %v471_v4 }
  0x12   :  { %429 = vmatpush3.bf16.msra.mxu1 %v428_v15  ;;  %450 = vmatpush3.bf16.msra.mxu0 %v449_v36 }
  0x13   :  { %430 = vmatprep.subr.bf16.mxu1 %v471_v4  ;;  %451 = vmatprep.subr.bf16.mxu0 %v471_v4 }
  0x16   :  { %432 = vmatpush3.bf16.msra.mxu1 %v431_v18  ;;  %453 = vmatpush3.bf16.msra.mxu0 %v452_v39 }
  0x17   :  { %433 = vmatprep.subr.bf16.mxu1 %v471_v4  ;;  %454 = vmatprep.subr.bf16.mxu0 %v471_v4 }
  0x1a   :  { %435 = vmatpush3.bf16.msra.mxu1 %v434_v21  ;;  %456 = vmatpush3.bf16.msra.mxu0 %v455_v42 }
  0x1b   :  { %436 = vmatprep.subr.bf16.mxu1 %v471_v4  ;;  %457 = vmatprep.subr.bf16.mxu0 %v471_v4 }
  0x1e   :  { %438 = vmatpush3.bf16.msra.mxu1 %v437_v24  ;;  %459 = vmatpush3.bf16.msra.mxu0 %v458_v45 }
  0x1f   :  { %439 = vmatprep.subr.bf16.mxu1 %v471_v4  ;;  %460 = vmatprep.subr.bf16.mxu0 %v471_v4 }
  0x22   :  { %441 = vmatpush3.bf16.msra.mxu1 %v440_v27  ;;  %462 = vmatpush3.bf16.msra.mxu0 %v461_v48 }
  0x23   :  { %463 = vmatprep.subr.bf16.mxu0 %v471_v4 }
  0x26   :  { %465 = vmatpush3.bf16.msra.mxu0 %v464_v56 }
  0xd6   :  { %v105_v50 = vpop.f32.mrb[0].mxu0 }
  0xd7   :  { %v106_v51 = vadd.f32 %v303_v49, %v105_v50  ;;  %v347_v52 = vpop.f32.mrb[1].mxu0 }
  0xd9   :  { %v109_v53 = vmax.f32 %v106_v51, 0.0 }
  0xdb   :  { %381 = vmatmul.mubr.f32.vlgmr.msra.gmra.mrb[0].mxu1 %v109_v53 }
 0x1ae   :  { %v199_v58 = vpop.f32.mrb[0].mxu1 }
 0x1af   :  { %v200_v59 = vadd.f32 %v305_v57, %v199_v58  ;;  %v382_v60 = vpop.f32.mrb[1].mxu1 }
 0x1b1   :  { %v203_v61 = vmax.f32 %v200_v59, 0.0 }
 0x1b3   :  { %416 = vmatmul.mubr.f32.vlgmr.msra.gmra.mrb[2].mxu0 %v203_v61 }
 0x286   :  { %v293_v63 = vpop.f32.mrb[2].mxu0 }
 0x287   :  { %v294_v0 = vadd.f32 %v306_v62, %v293_v63  ;;  %v417_v1 = vpop.f32.mrb[3].mxu0 }
 0x289   :  { %298 = vst.msk [vmem:[%s649_s7] sm:$0xff] %vm297_vm2, %v294_v0 }

</bundles_post_ra>
